<compile_context>
chip_gen: v5e
topology: v5e:2x2
jax: 0.10.0
libtpu: 0.0.40
codegen_flags: <defaults>
</compile_context>

<pallas_src>
import jax
import jax.numpy as jnp
from jax.experimental import pallas as pl
from jax.experimental.pallas import tpu as pltpu

_VMEM = pl.BlockSpec(memory_space=pltpu.MemorySpace.VMEM)


# ---------------------------------------------------------------------------
# Fused kernel
# ---------------------------------------------------------------------------
def _dense(h_f32, w_ref, b_ref):
    """y = h @ W + b.  Operands cast to W's dtype (bf16) for the MXU, f32 accum."""
    w = w_ref[...]
    y = jnp.dot(h_f32.astype(w.dtype), w, preferred_element_type=jnp.float32)
    return y + b_ref[...].astype(jnp.float32)          # (1, N) broadcasts over rows


def _make_fused_vae_kernel(n_enc_relu, n_dec_relu, latent_sz):
    """Build a kernel for a fixed layer stack.

    Ref layout:  x, eps, [w0, b0, w1, b1, ...], recon, mu, logvar
    Layer order: n_enc_relu relu layers, merged mu|logvar head,
                 n_dec_relu relu layers, fc4 (+sigmoid).
    """
    n_layers = n_enc_relu + 1 + n_dec_relu + 1

    def kernel(*refs):
        x_ref, eps_ref = refs[0], refs[1]
        wb = refs[2:2 + 2 * n_layers]
        recon_ref, mu_ref, logvar_ref = refs[2 + 2 * n_layers:]

        li = [0]

        def layer(h):
            y = _dense(h, wb[2 * li[0]], wb[2 * li[0] + 1])
            li[0] += 1
            return y

        # ---------------- encoder ----------------
        h = x_ref[...].astype(jnp.float32)
        for _ in range(n_enc_relu):
            h = jnp.maximum(layer(h), 0.0)
        head = layer(h)                                  # (B, 2*latent) = [mu | logvar]
        mu = head[:, :latent_sz]
        logvar = head[:, latent_sz:]

        # ------------- reparameterize -------------
        # z = eps * exp(0.5 * logvar) + mu   (all f32, exp goes to EUP)
        z = eps_ref[...].astype(jnp.float32) * jnp.exp(0.5 * logvar) + mu

        # ---------------- decoder ----------------
        h = z
        for _ in range(n_dec_relu):
            h = jnp.maximum(layer(h), 0.0)
        logits = layer(h)
        recon = 1.0 / (1.0 + jnp.exp(-logits))           # stable sigmoid, result in [0, 1]

        recon_ref[...] = recon.astype(recon_ref.dtype)
        mu_ref[...] = mu.astype(mu_ref.dtype)
        logvar_ref[...] = logvar.astype(logvar_ref.dtype)

    return kernel


# ---------------------------------------------------------------------------
# Parameter init (PyTorch nn.Linear-like uniform(+-1/sqrt(fan_in)))
# ---------------------------------------------------------------------------
def _init_linear(key, in_f, out_f, w_dtype=jnp.bfloat16):
    kw, kb = jax.random.split(key)
    bound = 1.0 / (in_f ** 0.5)
    # stored pre-transposed as (in, out) so the kernel computes x @ W
    w = jax.random.uniform(kw, (in_f, out_f), jnp.float32, -bound, bound).astype(w_dtype)
    b = jax.random.uniform(kb, (1, out_f), jnp.float32, -bound, bound)
    return w, b


def init_vae_params(key, input_sz, hidden_szs, latent_sz, w_dtype=jnp.bfloat16):
    cnt = [0]

    def nk():
        k = jax.random.fold_in(key, cnt[0])
        cnt[0] += 1
        return k

    params = {}
    params["fc1"] = _init_linear(nk(), input_sz, hidden_szs[0], w_dtype)
    params["fc1n"] = [
        _init_linear(nk(), hidden_szs[i], hidden_szs[i + 1], w_dtype)
        for i in range(len(hidden_szs) - 1)
    ]
    # merged fc21/fc22 head: one matmul producing [mu | logvar]
    w21, b21 = _init_linear(nk(), hidden_szs[-1], latent_sz, w_dtype)
    w22, b22 = _init_linear(nk(), hidden_szs[-1], latent_sz, w_dtype)
    params["fc2_head"] = (jnp.concatenate([w21, w22], axis=1),
                          jnp.concatenate([b21, b22], axis=1))
    params["fc3"] = _init_linear(nk(), latent_sz, hidden_szs[-1], w_dtype)
    params["fc3n"] = [
        _init_linear(nk(), hidden_szs[-i - 1], hidden_szs[-i - 2], w_dtype)
        for i in range(len(hidden_szs) - 1)
    ]
    params["fc4"] = _init_linear(nk(), hidden_szs[0], input_sz, w_dtype)
    return params


# ---------------------------------------------------------------------------
# Forward pass: one fused pallas_call
# ---------------------------------------------------------------------------
def vae_forward(params, x, eps):
    layers = [params["fc1"], *params["fc1n"], params["fc2_head"],
              params["fc3"], *params["fc3n"], params["fc4"]]
    n_enc_relu = 1 + len(params["fc1n"])
    n_dec_relu = 1 + len(params["fc3n"])
    batch, input_sz = x.shape
    latent_sz = eps.shape[1]

    flat = []
    for w, b in layers:
        flat.extend((w, b))

    flops = sum(2 * batch * w.shape[0] * w.shape[1] for w, _ in layers)
    transcendentals = batch * (latent_sz + input_sz)          # exp in reparam + sigmoid
    bytes_accessed = sum(int(a.size) * a.dtype.itemsize for a in (x, eps, *flat))
    bytes_accessed += 4 * (batch * input_sz + 2 * batch * latent_sz)

    kernel = _make_fused_vae_kernel(n_enc_relu, n_dec_relu, latent_sz)
    out_shape = (
        jax.ShapeDtypeStruct((batch, input_sz), jnp.float32),   # recon
        jax.ShapeDtypeStruct((batch, latent_sz), jnp.float32),  # mu
        jax.ShapeDtypeStruct((batch, latent_sz), jnp.float32),  # logvar
    )
    recon, mu, logvar = pl.pallas_call(
        kernel,
        out_shape=out_shape,
        in_specs=[_VMEM] * (2 + len(flat)),
        out_specs=(_VMEM, _VMEM, _VMEM),
        cost_estimate=pl.CostEstimate(flops=int(flops),
                                      transcendentals=int(transcendentals),
                                      bytes_accessed=int(bytes_accessed)),
    )(x, eps, *flat)
    return recon, mu, logvar


# ---------------------------------------------------------------------------
# Pure-JAX reference (same math / precision) for correctness check
# ---------------------------------------------------------------------------
def vae_forward_ref(params, x, eps):
    def dense(h, w, b):
        return jnp.dot(h.astype(w.dtype), w, preferred_element_type=jnp.float32) + b

    h = jnp.maximum(dense(x.astype(jnp.float32), *params["fc1"]), 0.0)
    for wb in params["fc1n"]:
        h = jnp.maximum(dense(h, *wb), 0.0)
    head = dense(h, *params["fc2_head"])
    latent = head.shape[1] // 2
    mu, logvar = head[:, :latent], head[:, latent:]
    z = eps * jnp.exp(0.5 * logvar) + mu
    h = jnp.maximum(dense(z, *params["fc3"]), 0.0)
    for wb in params["fc3n"]:
        h = jnp.maximum(dense(h, *wb), 0.0)
    recon = 1.0 / (1.0 + jnp.exp(-dense(h, *params["fc4"])))
    return recon, mu, logvar


# ---------------------------------------------------------------------------
if __name__ == "__main__":
    input_sz = 128
    hidden_szs = [64, 32]
    latent_sz = 16
    batch = 8

    root = jax.random.PRNGKey(0)
    k_params, k_x, k_eps = jax.random.split(root, 3)

    params = init_vae_params(k_params, input_sz, hidden_szs, latent_sz)
    x = jax.random.uniform(k_x, (batch, input_sz), jnp.float32)
    eps = jax.random.normal(k_eps, (batch, latent_sz), jnp.float32)   # eps ~ N(0,1)

    recon, mu, logvar = jax.jit(vae_forward)(params, x, eps)
    jax.block_until_ready((recon, mu, logvar))

    # shape + range checks (sigmoid output must lie in [0, 1])
    assert recon.shape == (batch, input_sz)
    assert mu.shape == (batch, latent_sz)
    assert logvar.shape == (batch, latent_sz)
    assert bool(jnp.all((recon >= 0.0) & (recon <= 1.0)))

    # numerical check vs pure-JAX reference of the same computation
    r_ref, m_ref, lv_ref = jax.jit(vae_forward_ref)(params, x, eps)
    assert bool(jnp.allclose(recon, r_ref, atol=1e-2, rtol=1e-2))
    assert bool(jnp.allclose(mu, m_ref, atol=1e-2, rtol=1e-2))
    assert bool(jnp.allclose(logvar, lv_ref, atol=1e-2, rtol=1e-2))

    print("KERNEL_OK")
</pallas_src>

<mosaic_0001>
module attributes {stable_mosaic.version = 11 : i64} {
  func.func @kernel(%arg0: memref<8x128xf32, #tpu.memory_space<vmem>>, %arg1: memref<8x16xf32, #tpu.memory_space<vmem>>, %arg2: memref<128x64xbf16, #tpu.memory_space<vmem>>, %arg3: memref<1x64xf32, #tpu.memory_space<vmem>>, %arg4: memref<64x32xbf16, #tpu.memory_space<vmem>>, %arg5: memref<1x32xf32, #tpu.memory_space<vmem>>, %arg6: memref<32x32xbf16, #tpu.memory_space<vmem>>, %arg7: memref<1x32xf32, #tpu.memory_space<vmem>>, %arg8: memref<16x32xbf16, #tpu.memory_space<vmem>>, %arg9: memref<1x32xf32, #tpu.memory_space<vmem>>, %arg10: memref<32x64xbf16, #tpu.memory_space<vmem>>, %arg11: memref<1x64xf32, #tpu.memory_space<vmem>>, %arg12: memref<64x128xbf16, #tpu.memory_space<vmem>>, %arg13: memref<1x128xf32, #tpu.memory_space<vmem>>, %arg14: memref<8x128xf32, #tpu.memory_space<vmem>>, %arg15: memref<8x16xf32, #tpu.memory_space<vmem>>, %arg16: memref<8x16xf32, #tpu.memory_space<vmem>>) attributes {dimension_semantics = [], scalar_prefetch = 0 : i64, scratch_operands = 0 : i64, tpu.core_type = #tpu.core_type<tc>} {
    %c0 = arith.constant 0 : index
    %c0_0 = arith.constant 0 : index
    %0 = vector.load %arg0[%c0, %c0_0] : memref<8x128xf32, #tpu.memory_space<vmem>>, vector<8x128xf32>
    %c0_1 = arith.constant 0 : index
    %c0_2 = arith.constant 0 : index
    %1 = vector.load %arg2[%c0_1, %c0_2] : memref<128x64xbf16, #tpu.memory_space<vmem>>, vector<128x64xbf16>
    %2 = arith.truncf %0 : vector<8x128xf32> to vector<8x128xbf16>
    %cst = arith.constant dense<0.000000e+00> : vector<8x64xf32>
    %3 = tpu.matmul %2, %1, %cst {dimension_numbers = #tpu.dot_dimension_numbers<[1], [0], [0], [1], [0, 0, 1, 1], [], []>} : vector<8x128xbf16>, vector<128x64xbf16>, vector<8x64xf32> -> vector<8x64xf32>
    %c0_3 = arith.constant 0 : index
    %c0_4 = arith.constant 0 : index
    %4 = vector.load %arg3[%c0_3, %c0_4] : memref<1x64xf32, #tpu.memory_space<vmem>>, vector<1x64xf32>
    %5 = vector.broadcast %4 : vector<1x64xf32> to vector<8x64xf32>
    %6 = arith.addf %3, %5 : vector<8x64xf32>
    %cst_5 = arith.constant 0.000000e+00 : f32
    %7 = vector.broadcast %cst_5 : f32 to vector<8x64xf32>
    %8 = arith.maximumf %6, %7 : vector<8x64xf32>
    %c0_6 = arith.constant 0 : index
    %c0_7 = arith.constant 0 : index
    %9 = vector.load %arg4[%c0_6, %c0_7] : memref<64x32xbf16, #tpu.memory_space<vmem>>, vector<64x32xbf16>
    %10 = arith.truncf %8 : vector<8x64xf32> to vector<8x64xbf16>
    %cst_8 = arith.constant dense<0.000000e+00> : vector<8x32xf32>
    %11 = tpu.matmul %10, %9, %cst_8 {dimension_numbers = #tpu.dot_dimension_numbers<[1], [0], [0], [1], [0, 0, 1, 1], [], []>} : vector<8x64xbf16>, vector<64x32xbf16>, vector<8x32xf32> -> vector<8x32xf32>
    %c0_9 = arith.constant 0 : index
    %c0_10 = arith.constant 0 : index
    %12 = vector.load %arg5[%c0_9, %c0_10] : memref<1x32xf32, #tpu.memory_space<vmem>>, vector<1x32xf32>
    %13 = vector.broadcast %12 : vector<1x32xf32> to vector<8x32xf32>
    %14 = arith.addf %11, %13 : vector<8x32xf32>
    %cst_11 = arith.constant 0.000000e+00 : f32
    %15 = vector.broadcast %cst_11 : f32 to vector<8x32xf32>
    %16 = arith.maximumf %14, %15 : vector<8x32xf32>
    %c0_12 = arith.constant 0 : index
    %c0_13 = arith.constant 0 : index
    %17 = vector.load %arg6[%c0_12, %c0_13] : memref<32x32xbf16, #tpu.memory_space<vmem>>, vector<32x32xbf16>
    %18 = arith.truncf %16 : vector<8x32xf32> to vector<8x32xbf16>
    %cst_14 = arith.constant dense<0.000000e+00> : vector<8x32xf32>
    %19 = tpu.matmul %18, %17, %cst_14 {dimension_numbers = #tpu.dot_dimension_numbers<[1], [0], [0], [1], [0, 0, 1, 1], [], []>} : vector<8x32xbf16>, vector<32x32xbf16>, vector<8x32xf32> -> vector<8x32xf32>
    %c0_15 = arith.constant 0 : index
    %c0_16 = arith.constant 0 : index
    %20 = vector.load %arg7[%c0_15, %c0_16] : memref<1x32xf32, #tpu.memory_space<vmem>>, vector<1x32xf32>
    %21 = vector.broadcast %20 : vector<1x32xf32> to vector<8x32xf32>
    %22 = arith.addf %19, %21 : vector<8x32xf32>
    %23 = vector.extract_strided_slice %22 {offsets = [0, 0], sizes = [8, 16], strides = [1, 1]} : vector<8x32xf32> to vector<8x16xf32>
    %24 = vector.extract_strided_slice %22 {offsets = [0, 16], sizes = [8, 16], strides = [1, 1]} : vector<8x32xf32> to vector<8x16xf32>
    %c0_17 = arith.constant 0 : index
    %c0_18 = arith.constant 0 : index
    %25 = vector.load %arg1[%c0_17, %c0_18] : memref<8x16xf32, #tpu.memory_space<vmem>>, vector<8x16xf32>
    %cst_19 = arith.constant 5.000000e-01 : f32
    %26 = vector.broadcast %cst_19 : f32 to vector<8x16xf32>
    %27 = arith.mulf %26, %24 : vector<8x16xf32>
    %28 = math.exp %27 : vector<8x16xf32>
    %29 = arith.mulf %25, %28 : vector<8x16xf32>
    %30 = arith.addf %29, %23 : vector<8x16xf32>
    %c0_20 = arith.constant 0 : index
    %c0_21 = arith.constant 0 : index
    %31 = vector.load %arg8[%c0_20, %c0_21] : memref<16x32xbf16, #tpu.memory_space<vmem>>, vector<16x32xbf16>
    %32 = arith.truncf %30 : vector<8x16xf32> to vector<8x16xbf16>
    %cst_22 = arith.constant dense<0.000000e+00> : vector<8x32xf32>
    %33 = tpu.matmul %32, %31, %cst_22 {dimension_numbers = #tpu.dot_dimension_numbers<[1], [0], [0], [1], [0, 0, 1, 1], [], []>} : vector<8x16xbf16>, vector<16x32xbf16>, vector<8x32xf32> -> vector<8x32xf32>
    %c0_23 = arith.constant 0 : index
    %c0_24 = arith.constant 0 : index
    %34 = vector.load %arg9[%c0_23, %c0_24] : memref<1x32xf32, #tpu.memory_space<vmem>>, vector<1x32xf32>
    %35 = vector.broadcast %34 : vector<1x32xf32> to vector<8x32xf32>
    %36 = arith.addf %33, %35 : vector<8x32xf32>
    %cst_25 = arith.constant 0.000000e+00 : f32
    %37 = vector.broadcast %cst_25 : f32 to vector<8x32xf32>
    %38 = arith.maximumf %36, %37 : vector<8x32xf32>
    %c0_26 = arith.constant 0 : index
    %c0_27 = arith.constant 0 : index
    %39 = vector.load %arg10[%c0_26, %c0_27] : memref<32x64xbf16, #tpu.memory_space<vmem>>, vector<32x64xbf16>
    %40 = arith.truncf %38 : vector<8x32xf32> to vector<8x32xbf16>
    %cst_28 = arith.constant dense<0.000000e+00> : vector<8x64xf32>
    %41 = tpu.matmul %40, %39, %cst_28 {dimension_numbers = #tpu.dot_dimension_numbers<[1], [0], [0], [1], [0, 0, 1, 1], [], []>} : vector<8x32xbf16>, vector<32x64xbf16>, vector<8x64xf32> -> vector<8x64xf32>
    %c0_29 = arith.constant 0 : index
    %c0_30 = arith.constant 0 : index
    %42 = vector.load %arg11[%c0_29, %c0_30] : memref<1x64xf32, #tpu.memory_space<vmem>>, vector<1x64xf32>
    %43 = vector.broadcast %42 : vector<1x64xf32> to vector<8x64xf32>
    %44 = arith.addf %41, %43 : vector<8x64xf32>
    %cst_31 = arith.constant 0.000000e+00 : f32
    %45 = vector.broadcast %cst_31 : f32 to vector<8x64xf32>
    %46 = arith.maximumf %44, %45 : vector<8x64xf32>
    %c0_32 = arith.constant 0 : index
    %c0_33 = arith.constant 0 : index
    %47 = vector.load %arg12[%c0_32, %c0_33] : memref<64x128xbf16, #tpu.memory_space<vmem>>, vector<64x128xbf16>
    %48 = arith.truncf %46 : vector<8x64xf32> to vector<8x64xbf16>
    %cst_34 = arith.constant dense<0.000000e+00> : vector<8x128xf32>
    %49 = tpu.matmul %48, %47, %cst_34 {dimension_numbers = #tpu.dot_dimension_numbers<[1], [0], [0], [1], [0, 0, 1, 1], [], []>} : vector<8x64xbf16>, vector<64x128xbf16>, vector<8x128xf32> -> vector<8x128xf32>
    %c0_35 = arith.constant 0 : index
    %c0_36 = arith.constant 0 : index
    %50 = vector.load %arg13[%c0_35, %c0_36] : memref<1x128xf32, #tpu.memory_space<vmem>>, vector<1x128xf32>
    %51 = vector.broadcast %50 : vector<1x128xf32> to vector<8x128xf32>
    %52 = arith.addf %49, %51 : vector<8x128xf32>
    %cst_37 = arith.constant 0.000000e+00 : f32
    %53 = vector.broadcast %cst_37 : f32 to vector<8x128xf32>
    %54 = arith.subf %53, %52 : vector<8x128xf32>
    %55 = math.exp %54 : vector<8x128xf32>
    %cst_38 = arith.constant 1.000000e+00 : f32
    %56 = vector.broadcast %cst_38 : f32 to vector<8x128xf32>
    %57 = arith.addf %56, %55 : vector<8x128xf32>
    %cst_39 = arith.constant 1.000000e+00 : f32
    %58 = vector.broadcast %cst_39 : f32 to vector<8x128xf32>
    %59 = arith.divf %58, %57 : vector<8x128xf32>
    %c0_40 = arith.constant 0 : index
    %c0_41 = arith.constant 0 : index
    %60 = vector.load %arg14[%c0_40, %c0_41] : memref<8x128xf32, #tpu.memory_space<vmem>>, vector<8x128xf32>
    tpu.vector_store %arg14[%c0_40, %c0_41], %59 {strides = array<i32>} : memref<8x128xf32, #tpu.memory_space<vmem>>, vector<8x128xf32>,
    %c0_42 = arith.constant 0 : index
    %c0_43 = arith.constant 0 : index
    %61 = vector.load %arg15[%c0_42, %c0_43] : memref<8x16xf32, #tpu.memory_space<vmem>>, vector<8x16xf32>
    tpu.vector_store %arg15[%c0_42, %c0_43], %23 {strides = array<i32>} : memref<8x16xf32, #tpu.memory_space<vmem>>, vector<8x16xf32>,
    %c0_44 = arith.constant 0 : index
    %c0_45 = arith.constant 0 : index
    %62 = vector.load %arg16[%c0_44, %c0_45] : memref<8x16xf32, #tpu.memory_space<vmem>>, vector<8x16xf32>
    tpu.vector_store %arg16[%c0_44, %c0_45], %24 {strides = array<i32>} : memref<8x16xf32, #tpu.memory_space<vmem>>, vector<8x16xf32>,
    return
  }
}

</mosaic_0001>

<bundles_post_ra>
// kernel: vae_forward.1
= control target key start
LH: loop header
LB: loop body
LE: loop exit
PB: predicated region body
PF: predicated region fallthrough
CT: control target
= control target key end

     0   :  { %s829_s0 = inlined_call_operand.vmem [shape: f32[8,128], index: 0, kind: input, shape index: {}]   ;;  %s830_s1 = inlined_call_operand.vmem [shape: f32[8,16], index: 1, kind: input, shape index: {}]   ;;  %s831_s2 = inlined_call_operand.vmem [shape: bf16[128,64], index: 2, kind: input, shape index: {}]   ;;  %s832_s3 = inlined_call_operand.vmem [shape: f32[1,64], index: 3, kind: input, shape index: {}]   ;;  %s833_s4 = inlined_call_operand.vmem [shape: bf16[64,32], index: 4, kind: input, shape index: {}]   ;;  %s834_s5 = inlined_call_operand.vmem [shape: f32[1,32], index: 5, kind: input, shape index: {}]   ;;  %s835_s6 = inlined_call_operand.vmem [shape: bf16[32,32], index: 6, kind: input, shape index: {}]   ;;  %s836_s7 = inlined_call_operand.vmem [shape: f32[1,32], index: 7, kind: input, shape index: {}]   ;;  %s837_s8 = inlined_call_operand.vmem [shape: bf16[16,32], index: 8, kind: input, shape index: {}]   ;;  %s838_s9 = inlined_call_operand.vmem [shape: f32[1,32], index: 9, kind: input, shape index: {}]   ;;  %s839_s10 = inlined_call_operand.vmem [shape: bf16[32,64], index: 10, kind: input, shape index: {}]   ;;  %s840_s11 = inlined_call_operand.vmem [shape: f32[1,64], index: 11, kind: input, shape index: {}]   ;;  %s841_s12 = inlined_call_operand.vmem [shape: bf16[64,128], index: 12, kind: input, shape index: {}]   ;;  %s842_s13 = inlined_call_operand.vmem [shape: f32[1,128], index: 13, kind: input, shape index: {}]   ;;  %s843_s14 = inlined_call_operand.hbm [shape: f32[8,128], index: 14, kind: output, shape index: {0}]   ;;  %s844_s15 = inlined_call_operand.hbm [shape: f32[8,16], index: 15, kind: output, shape index: {1}]   ;;  %s845_s16 = inlined_call_operand.hbm [shape: f32[8,16], index: 16, kind: output, shape index: {2}]  }
   0x1   :  { %846 = sst [smem:[#allocation9_spill]] %s829_s0 }
   0x2   :  { %22 = vsyncpa [#allocation3], 0  ;;  %v531_v0 = vld [vmem:[%s831_s2 + $0x38] sm:$0xff]  ;;  %v530_v1 = vld [vmem:[%s831_s2 + $0x30] sm:$0xff] }
   0x3   :  { %123 = vmatpush.bf16.msra.mxu0 %v531_v0  ;;  %v535_v2 = vld [vmem:[%s833_s4 + $0x18] sm:$0xff]  ;;  %v534_v3 = vld [vmem:[%s833_s4 + $0x10] sm:$0xff]  ;;  %v529_v4 = vld [vmem:[%s831_s2 + $0x28] sm:$0xff] }
   0x4   :  { %182 = vmatpush.bf16.msra.mxu1 %v535_v2 }
   0x7   :  { %124 = vmatpush.bf16.msra.mxu0 %v530_v1 }
   0x8   :  { %23 = vsyncpa [#allocation5], 0  ;;  %183 = vmatpush.bf16.msra.mxu1 %v534_v3  ;;  %v528_v5 = vld [vmem:[%s831_s2 + $0x20] sm:$0xff]  ;;  %v527_v6 = vld [vmem:[%s831_s2 + $0x18] sm:$0xff]  ;;  %s847_s28 = sld [smem:[#allocation9_spill]]  ;;  %vm174_vm0 = vcmask 523264  }
   0x9   :  { %v526_v7 = vld [vmem:[%s831_s2 + $0x10] sm:$0xff]  ;;  %v525_v8 = vld [vmem:[%s831_s2 + $0x8] sm:$0xff]  ;;  %v524_v9 = vld [vmem:[%s831_s2] sm:$0xff]  ;;  %vm213_vm1 = vcmask 261120   ;;  %vm253_vm2 = vcmask 130048   ;;  %s406_s23 = sshll.u32 %s844_s15, 4  ;;  %s407_s23 = int_to_ptr.hbm [resolvable:$true] %s406_s23 }
   0xa   :  { %v533_v12 = vld [vmem:[%s833_s4 + $0x8] sm:$0xff]  ;;  %v532_v13 = vld [vmem:[%s833_s4] sm:$0xff]  ;;  %v544_v44 = vld [vmem:[%s841_s12 + $0x18] sm:$0xff]  ;;  %s638_s24 = smov [#allocation4]   ;;  %s417_s26 = sshll.u32 %s845_s16, 4  ;;  %s418_s26 = int_to_ptr.hbm [resolvable:$true] %s417_s26 }
   0xb   :  { %125 = vmatpush.bf16.msra.mxu0 %v529_v4  ;;  %v549_v14 = vld [vmem:[%s832_s3] ss:$0 sm:$0xff]  ;;  %v537_v20 = vld [vmem:[%s835_s6 + $0x8] sm:$0xff]  ;;  %v543_v45 = vld [vmem:[%s841_s12 + $0x10] sm:$0xff]  ;;  %s640_s15 = smov [#allocation2]   ;;  %s395_s29 = sshll.u32 %s843_s14, 4  ;;  %s396_s29 = int_to_ptr.hbm [resolvable:$true] %s395_s29 }
   0xc   :  { %184 = vmatpush.bf16.msra.mxu1 %v533_v12  ;;  %223 = vmatpush.bf16.msra.mxu2 %v537_v20  ;;  %v536_v21 = vld [vmem:[%s835_s6] sm:$0xff]  ;;  %v540_v36 = vld [vmem:[%s839_s10 + $0x8] sm:$0xff]  ;;  %s393_s16 = sshll.u32 %s640_s15, 4  ;;  %s394_s16 = int_to_ptr.vmem [resolvable:$true] %s393_s16 }
   0xd   :  { %v550_v22 = vld [vmem:[%s834_s5] ss:$0 sm:$0xff]  ;;  %s637_s5 = smov 112   ;;  %v542_v46 = vld [vmem:[%s841_s12 + $0x8] sm:$0xff] }
   0xe   :  { %v53_v10 = vld [vmem:[%s847_s28] sm:$0xff] }
   0xf   :  { %126 = vmatpush.bf16.msra.mxu0 %v528_v5  ;;  %v70_v11 = vpack.c.bf16 %v53_v10, %v53_v10  ;;  %v551_v28 = vld [vmem:[%s836_s7] ss:$0 sm:$0xff] }
  0x10   :  { %185 = vmatpush.bf16.msra.mxu1 %v532_v13  ;;  %224 = vmatpush.bf16.msra.mxu2 %v536_v21  ;;  %v538_v35 = vld [vmem:[%s837_s8] sm:$0xff] }
  0x11   :  { %264 = vmatpush.bf16.msra.mxu3 %v538_v35  ;;  %v539_v37 = vld [vmem:[%s839_s10] sm:$0xff] }
  0x12   :  { %v230_v38 = vld [vmem:[%s830_s1] sm:$0xff] }
  0x13   :  { %127 = vmatpush.bf16.msra.mxu0 %v527_v6  ;;  %v552_v47 = vld [vmem:[%s838_s9] ss:$0 sm:$0xff] }
  0x14   :  { %353 = vmatpush.bf16.msrb.mxu2 %v544_v44  ;;  %v541_v53 = vld [vmem:[%s841_s12] sm:$0xff]  ;;  %s639_s12 = smov [#allocation6]  }
  0x15   :  { %301 = vmatpush.bf16.msrb.mxu3 %v540_v36  ;;  %v553_v54 = vld [vmem:[%s840_s11] ss:$0 sm:$0xff]  ;;  %s415_s6 = sshll.u32 %s639_s12, 4  ;;  %s416_s6 = int_to_ptr.vmem [resolvable:$true] %s415_s6 }
  0x16   :  { %v554_v60 = vld [vmem:[%s842_s13] ss:$0 sm:$0xff] }
  0x17   :  { %128 = vmatpush.bf16.msra.mxu0 %v526_v7 }
  0x18   :  { %354 = vmatpush.bf16.msrb.mxu2 %v543_v45 }
  0x19   :  { %302 = vmatpush.bf16.msrb.mxu3 %v539_v37 }
  0x1b   :  { %129 = vmatpush.bf16.msra.mxu0 %v525_v8 }
  0x1c   :  { %355 = vmatpush.bf16.msrb.mxu2 %v542_v46 }
  0x1f   :  { %130 = vmatpush.bf16.msra.mxu0 %v524_v9 }
  0x20   :  { %356 = vmatpush.bf16.msrb.mxu2 %v541_v53 }
  0x22   :  { %131 = vmatmul.bf16.vlgmr.msra.gmra.mxu0 %v70_v11 }
  0x9f   :  { %v132_v15 = vpop.f32.mrf.mxu0 }
  0xa0   :  { %v133_v16 = vadd.f32 %v549_v14, %v132_v15 }
  0xa2   :  { %v136_v17 = vmax.f32 %v133_v16, 0.0 }
  0xa4   :  { %v145_v18 = vpack.c.bf16 %v136_v17, %v136_v17 }
  0xa6   :  { %483 = vmatmul.msk.bf16.vlgmr.msra.gmra.mxu1 %vm174_vm0, %v145_v18 }
  0xa7   :  { %v134_v19 = vpop.f32.mrf.mxu0 }
 0x123   :  { %v187_v23 = vpop.f32.mrf.mxu1 }
 0x124   :  { %v188_v24 = vadd.f32 %v550_v22, %v187_v23 }
 0x126   :  { %v191_v25 = vmax.f32 %v188_v24, 0.0 }
 0x128   :  { %v196_v26 = vpack.c.bf16 %v191_v25, %v191_v25 }
 0x12a   :  { %492 = vmatmul.msk.bf16.vlgmr.msra.gmra.mxu2 %vm213_vm1, %v196_v26 }
 0x12b   :  { %v189_v27 = vpop.f32.mrf.mxu1 }
 0x1ad   :  { %v226_v29 = vpop.f32.mrf.mxu2 }
 0x1ae   :  { %v227_v30 = vadd.f32 %v551_v28, %v226_v29 }
 0x1b0   :  { %v231_v31 = vmul.f32 0.5, %v227_v30  ;;  %382 = vst.msk [vmem:[#allocation4] sm:$0xff] %vm253_vm2, %v227_v30 }
 0x1b2   :  { %v232_v32 = vmul.f32 1.442695, %v231_v31 }
 0x1b4   :  { %555 = vpow2.f32 %v232_v32 }
 0x1b5   :  { %v228_v33 = vpop.f32.mrf.mxu2 }
 0x1ba   :  { %v556_v34 = vpop.eup %555 }
 0x1bb   :  { %235 = vrot.lane.b32.xlu0 %v556_v34, %s637_s5 }
 0x1c3   :  { %384 = vrot.lane.b32.xlu0 %v227_v30, %s637_s5  ;;  %s404_s5 = sshll.u32 %s638_s24, 4  ;;  %s405_s5 = int_to_ptr.vmem [resolvable:$true] %s404_s5 }
 0x1c4   :  { %409 = dma.vmem_to_hbm [thread:$0]  %s405_s5, 128, %s407_s23, [#allocation5]  }
 0x22d   :  { %v236_v39 = vpop.permute.xlu0 %235 }
 0x22e   :  { %v238_v40 = vmul.f32 %v236_v39, %v230_v38 }
 0x230   :  { %v239_v41 = vadd.f32 %v238_v40, %v227_v30 }
 0x232   :  { %v242_v42 = vpack.c.bf16 %v239_v41, %v239_v41 }
 0x234   :  { %497 = vmatmul.msk.bf16.vlgmr.msra.gmra.mxu3 %vm253_vm2, %v242_v42 }
 0x235   :  { %v385_v43 = vpop.permute.xlu0 %384 }
 0x236   :  { %387 = vst.msk [vmem:[#allocation6] sm:$0xff] %vm253_vm2, %v385_v43 }
 0x237   :  { %420 = dma.vmem_to_hbm [thread:$0]  %s416_s6, 128, %s418_s26, [#allocation5]  }
 0x2b7   :  { %v266_v48 = vpop.f32.mrf.mxu3 }
 0x2b8   :  { %v267_v49 = vadd.f32 %v552_v47, %v266_v48 }
 0x2ba   :  { %v270_v50 = vmax.f32 %v267_v49, 0.0 }
 0x2bc   :  { %v275_v51 = vpack.c.bf16 %v270_v50, %v270_v50 }
 0x2be   :  { %506 = vmatmul.msk.bf16.vlgmr.msrb.gmra.mxu3 %vm213_vm1, %v275_v51 }
 0x2bf   :  { %v268_v52 = vpop.f32.mrf.mxu3 }
 0x341   :  { %v304_v55 = vpop.f32.mrf.mxu3 }
 0x342   :  { %v305_v56 = vadd.f32 %v553_v54, %v304_v55 }
 0x344   :  { %v308_v57 = vmax.f32 %v305_v56, 0.0 }
 0x346   :  { %v317_v58 = vpack.c.bf16 %v308_v57, %v308_v57 }
 0x348   :  { %523 = vmatmul.msk.bf16.vlgmr.msrb.gmra.mxu2 %vm174_vm0, %v317_v58 }
 0x349   :  { %v306_v59 = vpop.f32.mrf.mxu3 }
 0x3cb   :  { %v358_v61 = vpop.f32.mrf.mxu2 }
 0x3cc   :  { %v359_v62 = vadd.f32 %v554_v60, %v358_v61 }
 0x3ce   :  { %v362_v63 = vsub.f32 0.0, %v359_v62 }
 0x3d0   :  { %v363_v0 = vmul.f32 1.442695, %v362_v63 }
 0x3d2   :  { %557 = vpow2.f32 %v363_v0 }
 0x3d3   :  { %v360_v1 = vpop.f32.mrf.mxu2 }
 0x3d8   :  { %v558_v2 = vpop.eup %557 }
 0x3d9   :  { %v365_v3 = vadd.f32 1.0, %v558_v2 }
 0x3db   :  { %559 = vrcp.f32 %v365_v3  ;;  %v377_v7 = vand.u32 2147483648, %v365_v3  ;;  %v375_v9 = vand.u32 2147483647, %v365_v3  ;;  %vm371_vm4 = vweird.f32 %v365_v3 }
 0x3dd   :  { %v378_v11 = vor.u32 1.1754944e-38, %v377_v7  ;;  %vm376_vm6 = vcmp.eq.f32.partialorder %v375_v9, 8.507059e+37 }
 0x3e1   :  { %v560_v4 = vpop.eup %559 }
 0x3e2   :  { %v367_v5 = vmul.f32 %v560_v4, %v365_v3  ;;  %vm372_vm3 = vweird.f32 %v560_v4 }
 0x3e3   :  { %vm373_vm5 = vmor %vm371_vm4, %vm372_vm3 }
 0x3e4   :  { %v368_v6 = vsub.f32 1.0, %v367_v5 }
 0x3e6   :  { %v369_v8 = vmul.f32 %v560_v4, %v368_v6 }
 0x3e8   :  { %v370_v10 = vadd.f32 %v560_v4, %v369_v8 }
 0x3ea   :  { %v374_v12 = vsel %vm373_vm5, %v560_v4, %v370_v10 }
 0x3eb   :  { %v379_v13 = vsel %vm376_vm6, %v378_v11, %v374_v12 }
 0x3ec   :  { %381 = vst [vmem:[#allocation2] sm:$0xff] %v379_v13 }
 0x3ed   :  { %398 = dma.vmem_to_hbm [thread:$0]  %s394_s16, 128, %s396_s29, [#allocation3]  }
 0x3ee   :  { %633 = dma.done.wait [#allocation3], 128  }
 0x3ef   :  { %634 = vsyncadd [#allocation3], 4294967168 }
 0x3f0   :  { %635 = dma.done.wait [#allocation5], 256  }
 0x3f1   :  { %636 = vsyncadd [#allocation5], 4294967040 }
 0x3f2   :  { %433 = vsyncpa [#allocation3], 1 }
 0x3f3   :  { %434 = vsyncpa [#allocation5], 1 }

</bundles_post_ra>
